<compile_context>
chip_gen: v7x
topology: tpu7x:2x2x1
jax: 0.10.0
libtpu: 0.0.40
codegen_flags: <defaults>
</compile_context>

<pallas_src>
import functools

import jax
import jax.numpy as jnp
from jax.experimental import pallas as pl
from jax.experimental.pallas import tpu as pltpu

LANE = 128  # vreg lane width


def _round_up(n: int, m: int) -> int:
    return ((n + m - 1) // m) * m


def qnet_kernel(x_ref, w1_ref, b1_ref, w2_ref, b2_ref, w3_ref, b3_ref, out_ref):
    """Fused forward for one batch tile: relu(relu(x@W1+b1)@W2+b2)@W3+b3.

    Weights are bf16 (MXU-native); x is cast to bf16 in-register; accumulation,
    bias-add and ReLU stay f32. The final store is the narrow (tb, n_actions)
    f32 result — no padded lanes ever hit HBM.
    """
    x = x_ref[...].astype(jnp.bfloat16)  # (tb, S); cast in vregs, no extra HBM pass

    h1 = jnp.dot(x, w1_ref[...], preferred_element_type=jnp.float32) + b1_ref[...]
    h1 = jnp.maximum(h1, 0.0).astype(jnp.bfloat16)

    h2 = jnp.dot(h1, w2_ref[...], preferred_element_type=jnp.float32) + b2_ref[...]
    h2 = jnp.maximum(h2, 0.0).astype(jnp.bfloat16)

    out = jnp.dot(h2, w3_ref[...], preferred_element_type=jnp.float32) + b3_ref[...]
    out_ref[...] = out.astype(out_ref.dtype)  # (tb, n_actions) — narrow store


@functools.partial(jax.jit, static_argnames=("block_b",))
def q_net_forward(x, padded_params, *, block_b=1024):
    """x: (B, N_STATES) f32. Returns (B, N_ACTIONS) f32 Q-values."""
    w1, b1, w2, b2, w3, b3 = padded_params
    B, n_states = x.shape
    h1p = w1.shape[1]
    h2p = w2.shape[1]
    n_actions = w3.shape[1]

    # Batch tile: sublane-aligned and large (per-grid-step overhead ~0.35us).
    tb = min(_round_up(block_b, 16), _round_up(B, 8))
    # Ensure >= 2 grid steps when the batch allows it, so the "parallel" axis
    # can actually shard across v7x's two TensorCores.
    if pl.cdiv(B, tb) < 2 and B >= 32:
        tb = _round_up(pl.cdiv(B, 2), 8)
    grid = (pl.cdiv(B, tb),)  # partial last block handled by Pallas (no jnp.pad copy)

    return pl.pallas_call(
        qnet_kernel,
        out_shape=jax.ShapeDtypeStruct((B, n_actions), jnp.float32),
        grid_spec=pltpu.PrefetchScalarGridSpec(
            num_scalar_prefetch=0,
            grid=grid,
            in_specs=[
                # Batch-tiled activations (double-buffered by the pipeline).
                pl.BlockSpec((tb, n_states), lambda i: (i, 0)),
                # Weights / biases: constant index_map -> resident in VMEM.
                pl.BlockSpec((n_states, h1p), lambda i: (0, 0)),
                pl.BlockSpec((1, h1p), lambda i: (0, 0)),
                pl.BlockSpec((h1p, h2p), lambda i: (0, 0)),
                pl.BlockSpec((1, h2p), lambda i: (0, 0)),
                pl.BlockSpec((h2p, n_actions), lambda i: (0, 0)),
                pl.BlockSpec((1, n_actions), lambda i: (0, 0)),
            ],
            out_specs=pl.BlockSpec((tb, n_actions), lambda i: (i, 0)),
        ),
        compiler_params=pltpu.CompilerParams(
            dimension_semantics=("parallel",),  # batch tiles shard across TCs (v7x)
        ),
    )(x, w1, b1, w2, b2, w3, b3)


def init_params(key, n_states, n_actions, h1, h2, std=0.1):
    """Mimics utils.weights_init_normal(mean=0.0, std=0.1) for fc1, fc2, out.

    Weights are stored (in_features, out_features) so the kernel does x @ W.
    """
    ks = jax.random.split(key, 6)
    w1 = (std * jax.random.normal(ks[0], (n_states, h1))).astype(jnp.float32)
    b1 = (std * jax.random.normal(ks[1], (1, h1))).astype(jnp.float32)
    w2 = (std * jax.random.normal(ks[2], (h1, h2))).astype(jnp.float32)
    b2 = (std * jax.random.normal(ks[3], (1, h2))).astype(jnp.float32)
    w3 = (std * jax.random.normal(ks[4], (h2, n_actions))).astype(jnp.float32)
    b3 = (std * jax.random.normal(ks[5], (1, n_actions))).astype(jnp.float32)
    return w1, b1, w2, b2, w3, b3


def _pad2d(a, rows, cols, dtype):
    out = jnp.zeros((rows, cols), dtype)
    return out.at[: a.shape[0], : a.shape[1]].set(a.astype(dtype))


def prepare_params(params):
    """One-time prep: pad hidden dims to 128 lanes (zero-fill) + bf16 weights.

    The final layer's output width is NOT padded, so the kernel emits the
    narrow (B, n_actions) result directly.
    """
    w1, b1, w2, b2, w3, b3 = params
    n_states, h1 = w1.shape
    h2 = w2.shape[1]
    n_actions = w3.shape[1]
    h1p = _round_up(h1, LANE)
    h2p = _round_up(h2, LANE)
    return (
        _pad2d(w1, n_states, h1p, jnp.bfloat16),
        _pad2d(b1, 1, h1p, jnp.float32),
        _pad2d(w2, h1p, h2p, jnp.bfloat16),
        _pad2d(b2, 1, h2p, jnp.float32),
        _pad2d(w3, h2p, n_actions, jnp.bfloat16),
        b3.astype(jnp.float32),
    )


def reference_forward(x, w1, b1, w2, b2, w3, b3):
    h1 = jnp.maximum(x @ w1 + b1, 0.0)
    h2 = jnp.maximum(h1 @ w2 + b2, 0.0)
    return h2 @ w3 + b3


if __name__ == "__main__":
    # Small shapes consistent with the module: N_STATES=16, H1=H2=32, N_ACTIONS=4.
    N_STATES, N_ACTIONS, H1, H2 = 16, 4, 32, 32
    BATCH = 8

    key = jax.random.PRNGKey(0)
    kx, kp = jax.random.split(key)
    x = jax.random.normal(kx, (BATCH, N_STATES), dtype=jnp.float32)
    params = init_params(kp, N_STATES, N_ACTIONS, H1, H2)
    padded_params = prepare_params(params)

    actions_value = q_net_forward(x, padded_params)
    jax.block_until_ready(actions_value)

    ref = reference_forward(x, *params)
    assert actions_value.shape == (BATCH, N_ACTIONS)
    # bf16 MXU operands -> loosened tolerance vs. the f32 reference.
    assert jnp.allclose(actions_value, ref, atol=5e-2, rtol=5e-2)

    # Larger, non-tile-aligned batch exercises the multi-step grid (>=2 tiles
    # for v7x megacore) and the partial last block (no jnp.pad copy of x).
    BATCH2 = 300
    x2 = jax.random.normal(jax.random.PRNGKey(1), (BATCH2, N_STATES), dtype=jnp.float32)
    av2 = q_net_forward(x2, padded_params, block_b=128)
    jax.block_until_ready(av2)
    ref2 = reference_forward(x2, *params)
    assert av2.shape == (BATCH2, N_ACTIONS)
    assert jnp.allclose(av2, ref2, atol=5e-2, rtol=5e-2)

    print("KERNEL_OK")
</pallas_src>

<mosaic_0001>
module attributes {stable_mosaic.version = 11 : i64} {
  func.func @qnet_kernel(%arg0: i32, %arg1: memref<8x16xf32, #tpu.memory_space<vmem>>, %arg2: memref<16x128xbf16, #tpu.memory_space<vmem>>, %arg3: memref<1x128xf32, #tpu.memory_space<vmem>>, %arg4: memref<128x128xbf16, #tpu.memory_space<vmem>>, %arg5: memref<1x128xf32, #tpu.memory_space<vmem>>, %arg6: memref<128x4xbf16, #tpu.memory_space<vmem>>, %arg7: memref<1x4xf32, #tpu.memory_space<vmem>>, %arg8: memref<8x4xf32, #tpu.memory_space<vmem>>) attributes {dimension_semantics = [#tpu.dimension_semantics<parallel>], iteration_bounds = array<i64: 1>, scalar_prefetch = 0 : i64, scratch_operands = 0 : i64, tpu.core_type = #tpu.core_type<tc>, window_params = [{transform_indices = @transform_0, window_bounds = array<i64: 8, 16>}, {pipeline_mode = #tpu.pipeline_mode<synchronous>, transform_indices = @transform_1, window_bounds = array<i64: 16, 128>}, {pipeline_mode = #tpu.pipeline_mode<synchronous>, transform_indices = @transform_2, window_bounds = array<i64: 1, 128>}, {pipeline_mode = #tpu.pipeline_mode<synchronous>, transform_indices = @transform_3, window_bounds = array<i64: 128, 128>}, {pipeline_mode = #tpu.pipeline_mode<synchronous>, transform_indices = @transform_4, window_bounds = array<i64: 1, 128>}, {pipeline_mode = #tpu.pipeline_mode<synchronous>, transform_indices = @transform_5, window_bounds = array<i64: 128, 4>}, {pipeline_mode = #tpu.pipeline_mode<synchronous>, transform_indices = @transform_6, window_bounds = array<i64: 1, 4>}, {transform_indices = @transform_7, window_bounds = array<i64: 8, 4>}]} {
    %c0 = arith.constant 0 : index
    %c0_0 = arith.constant 0 : index
    %0 = vector.load %arg1[%c0, %c0_0] : memref<8x16xf32, #tpu.memory_space<vmem>>, vector<8x16xf32>
    %1 = arith.truncf %0 : vector<8x16xf32> to vector<8x16xbf16>
    %c0_1 = arith.constant 0 : index
    %c0_2 = arith.constant 0 : index
    %2 = vector.load %arg2[%c0_1, %c0_2] : memref<16x128xbf16, #tpu.memory_space<vmem>>, vector<16x128xbf16>
    %cst = arith.constant dense<0.000000e+00> : vector<8x128xf32>
    %3 = tpu.matmul %1, %2, %cst {dimension_numbers = #tpu.dot_dimension_numbers<[1], [0], [0], [1], [0, 0, 1, 1], [], []>} : vector<8x16xbf16>, vector<16x128xbf16>, vector<8x128xf32> -> vector<8x128xf32>
    %c0_3 = arith.constant 0 : index
    %c0_4 = arith.constant 0 : index
    %4 = vector.load %arg3[%c0_3, %c0_4] : memref<1x128xf32, #tpu.memory_space<vmem>>, vector<1x128xf32>
    %5 = vector.broadcast %4 : vector<1x128xf32> to vector<8x128xf32>
    %6 = arith.addf %3, %5 : vector<8x128xf32>
    %cst_5 = arith.constant 0.000000e+00 : f32
    %7 = vector.broadcast %cst_5 : f32 to vector<8x128xf32>
    %8 = arith.maximumf %6, %7 : vector<8x128xf32>
    %9 = arith.truncf %8 : vector<8x128xf32> to vector<8x128xbf16>
    %c0_6 = arith.constant 0 : index
    %c0_7 = arith.constant 0 : index
    %10 = vector.load %arg4[%c0_6, %c0_7] : memref<128x128xbf16, #tpu.memory_space<vmem>>, vector<128x128xbf16>
    %cst_8 = arith.constant dense<0.000000e+00> : vector<8x128xf32>
    %11 = tpu.matmul %9, %10, %cst_8 {dimension_numbers = #tpu.dot_dimension_numbers<[1], [0], [0], [1], [0, 0, 1, 1], [], []>} : vector<8x128xbf16>, vector<128x128xbf16>, vector<8x128xf32> -> vector<8x128xf32>
    %c0_9 = arith.constant 0 : index
    %c0_10 = arith.constant 0 : index
    %12 = vector.load %arg5[%c0_9, %c0_10] : memref<1x128xf32, #tpu.memory_space<vmem>>, vector<1x128xf32>
    %13 = vector.broadcast %12 : vector<1x128xf32> to vector<8x128xf32>
    %14 = arith.addf %11, %13 : vector<8x128xf32>
    %cst_11 = arith.constant 0.000000e+00 : f32
    %15 = vector.broadcast %cst_11 : f32 to vector<8x128xf32>
    %16 = arith.maximumf %14, %15 : vector<8x128xf32>
    %17 = arith.truncf %16 : vector<8x128xf32> to vector<8x128xbf16>
    %c0_12 = arith.constant 0 : index
    %c0_13 = arith.constant 0 : index
    %18 = vector.load %arg6[%c0_12, %c0_13] : memref<128x4xbf16, #tpu.memory_space<vmem>>, vector<128x4xbf16>
    %cst_14 = arith.constant dense<0.000000e+00> : vector<8x4xf32>
    %19 = tpu.matmul %17, %18, %cst_14 {dimension_numbers = #tpu.dot_dimension_numbers<[1], [0], [0], [1], [0, 0, 1, 1], [], []>} : vector<8x128xbf16>, vector<128x4xbf16>, vector<8x4xf32> -> vector<8x4xf32>
    %c0_15 = arith.constant 0 : index
    %c0_16 = arith.constant 0 : index
    %20 = vector.load %arg7[%c0_15, %c0_16] : memref<1x4xf32, #tpu.memory_space<vmem>>, vector<1x4xf32>
    %21 = vector.broadcast %20 : vector<1x4xf32> to vector<8x4xf32>
    %22 = arith.addf %19, %21 : vector<8x4xf32>
    %c0_17 = arith.constant 0 : index
    %c0_18 = arith.constant 0 : index
    %23 = vector.load %arg8[%c0_17, %c0_18] : memref<8x4xf32, #tpu.memory_space<vmem>>, vector<8x4xf32>
    tpu.vector_store %arg8[%c0_17, %c0_18], %22 {strides = array<i32>} : memref<8x4xf32, #tpu.memory_space<vmem>>, vector<8x4xf32>,
    return
  }
  func.func @transform_0(%arg0: i32) -> (i32, i32) {
    %c0_i32 = arith.constant 0 : i32
    %c0_i32_0 = arith.constant 0 : i32
    return %arg0, %c0_i32 : i32, i32
  }
  func.func @transform_1(%arg0: i32) -> (i32, i32) {
    %c0_i32 = arith.constant 0 : i32
    %c0_i32_0 = arith.constant 0 : i32
    %c0_i32_1 = arith.constant 0 : i32
    return %c0_i32, %c0_i32_0 : i32, i32
  }
  func.func @transform_2(%arg0: i32) -> (i32, i32) {
    %c0_i32 = arith.constant 0 : i32
    %c0_i32_0 = arith.constant 0 : i32
    %c0_i32_1 = arith.constant 0 : i32
    return %c0_i32, %c0_i32_0 : i32, i32
  }
  func.func @transform_3(%arg0: i32) -> (i32, i32) {
    %c0_i32 = arith.constant 0 : i32
    %c0_i32_0 = arith.constant 0 : i32
    %c0_i32_1 = arith.constant 0 : i32
    return %c0_i32, %c0_i32_0 : i32, i32
  }
  func.func @transform_4(%arg0: i32) -> (i32, i32) {
    %c0_i32 = arith.constant 0 : i32
    %c0_i32_0 = arith.constant 0 : i32
    %c0_i32_1 = arith.constant 0 : i32
    return %c0_i32, %c0_i32_0 : i32, i32
  }
  func.func @transform_5(%arg0: i32) -> (i32, i32) {
    %c0_i32 = arith.constant 0 : i32
    %c0_i32_0 = arith.constant 0 : i32
    %c0_i32_1 = arith.constant 0 : i32
    return %c0_i32, %c0_i32_0 : i32, i32
  }
  func.func @transform_6(%arg0: i32) -> (i32, i32) {
    %c0_i32 = arith.constant 0 : i32
    %c0_i32_0 = arith.constant 0 : i32
    %c0_i32_1 = arith.constant 0 : i32
    return %c0_i32, %c0_i32_0 : i32, i32
  }
  func.func @transform_7(%arg0: i32) -> (i32, i32) {
    %c0_i32 = arith.constant 0 : i32
    %c0_i32_0 = arith.constant 0 : i32
    return %arg0, %c0_i32 : i32, i32
  }
}

</mosaic_0001>

<bundles_post_ra>
// kernel: q_net_forward.1
= control target key start
LH: loop header
LB: loop body
LE: loop exit
PB: predicated region body
PF: predicated region fallthrough
CT: control target
= control target key end

     0   :  { %12 = vsyncpa [#allocation3], 0  ;;  %s468_s24 = smov [#allocation2]   ;;  %s608_s0 = inlined_call_operand.vmem [shape: f32[8,16], index: 0, kind: input, shape index: {}]   ;;  %s609_s1 = inlined_call_operand.hbm [shape: bf16[16,128], index: 1, kind: input, shape index: {}]   ;;  %s610_s2 = inlined_call_operand.vmem [shape: f32[1,128], index: 2, kind: input, shape index: {}]   ;;  %s611_s3 = inlined_call_operand.vmem [shape: bf16[128,128], index: 3, kind: input, shape index: {}]   ;;  %s612_s4 = inlined_call_operand.vmem [shape: f32[1,128], index: 4, kind: input, shape index: {}]   ;;  %s613_s5 = inlined_call_operand.vmem [shape: bf16[128,4], index: 5, kind: input, shape index: {}]   ;;  %s614_s6 = inlined_call_operand.vmem [shape: f32[1,4], index: 6, kind: input, shape index: {}]   ;;  %s615_s7 = inlined_call_operand.vmem [shape: f32[8,4], index: 7, kind: output, shape index: {}]  }
   0x1   :  { %s20_s25 = sshll.u32 %s468_s24, 4  ;;  %s444_s28 = scalar_lea.hbm %s609_s1, 128  ;;  %s21_s25 = int_to_ptr.vmem [resolvable:$true] %s20_s25 }
   0x2   :  { %p445_p0 = scmp.ne.s32.totalorder %s609_s1, %s444_s28  ;;  %p448_p1 = scmp.lt.u32.totalorder %s444_s28, %s609_s1 }
   0x4   :  { %p450_p2 = pnand %p448_p1, %p445_p0 }
   0x6   :  { %453 = shalt.err (!%p450_p2)
}
   0x7   :  { %s454_s10 = scalar_lea.vmem %s21_s25, 128  ;;  %p459_p4 = scmp.lt.s32.totalorder %s21_s25, %s21_s25 }
   0x8   :  { %p455_p3 = scmp.ne.s32.totalorder %s21_s25, %s454_s10  ;;  %p460_p5 = scmp.lt.s32.totalorder %s454_s10, %s454_s10 }
   0xa   :  { %p461_p6 = por %p460_p5, %p459_p4 }
   0xc   :  { %p462_p7 = pnand %p461_p6, %p455_p3 }
   0xe   :  { %465 = shalt.err (!%p462_p7)
}
   0xf   :  { %s469_s11 = smov 64   ;;  %s470_s12 = smov 4  }
  0x10   :  { %26 = dma.hbm_to_vmem [thread:$0]  %s609_s1, 128, %s21_s25, [#allocation3], %s469_s11, %s469_s11, %s470_s12  }
  0x11   :  { %466 = dma.done.wait [#allocation3], 128  }
  0x12   :  { %467 = vsyncadd [#allocation3], 4294967168  ;;  %v471_v0 = vmov 0.0   ;;  %vm472_vm0 = vmmov 0   ;;  %v427_v1 = vld [vmem:[#allocation2] sm:$0xff]   ;;  %vm58_vm1 = vcmask 130048  }
  0x13   :  { %376 = vmatprep.subr.bf16.mxu0 %v471_v0  ;;  %378 = vmatprep.mubr.msk.bf16.mxu0 %vm472_vm0, %v471_v0  ;;  %v41_v2 = vld [vmem:[%s608_s0] sm:$0xff]  ;;  %v429_v5 = vld [vmem:[%s611_s3 + $0x8] sm:$0xff]   ;;  %v430_v6 = vld [vmem:[%s611_s3 + $0x10] sm:$0xff]   ;;  %vm328_vm2 = vcmask 31744  }
  0x14   :  { %382 = vmatprep.subr.bf16.mxu1 %v471_v0  ;;  %398 = vmatprep.mubr.msk.bf16.mxu1 %vm472_vm0, %v471_v0  ;;  %v42_v3 = vpack.c.bf16 %v41_v2, %v41_v2  ;;  %v428_v4 = vld [vmem:[%s611_s3] sm:$0xff]   ;;  %v431_v7 = vld [vmem:[%s611_s3 + $0x18] sm:$0xff]   ;;  %v433_v9 = vld [vmem:[%s611_s3 + $0x28] sm:$0xff]  }
  0x15   :  { %377 = vmatpush3.bf16.msra.mxu0 %v427_v1  ;;  %383 = vmatpush3.bf16.msra.mxu1 %v428_v4  ;;  %v432_v8 = vld [vmem:[%s611_s3 + $0x20] sm:$0xff]   ;;  %v434_v10 = vld [vmem:[%s611_s3 + $0x30] sm:$0xff]   ;;  %v435_v11 = vld [vmem:[%s611_s3 + $0x38] sm:$0xff]  }
  0x16   :  { %402 = vmatprep.subr.bf16.mxu0 %v471_v0  ;;  %384 = vmatprep.subr.bf16.mxu1 %v471_v0  ;;  %v436_v12 = vld [vmem:[%s613_s5] sm:$0xff]   ;;  %v437_v13 = vld [vmem:[%s613_s5 + $0x8] sm:$0xff]   ;;  %v438_v14 = vld [vmem:[%s613_s5 + $0x10] sm:$0xff]  }
  0x17   :  { %v439_v15 = vld [vmem:[%s613_s5 + $0x18] sm:$0xff]   ;;  %v440_v16 = vld [vmem:[%s613_s5 + $0x20] sm:$0xff]   ;;  %v441_v17 = vld [vmem:[%s613_s5 + $0x28] sm:$0xff]  }
  0x18   :  { %379 = vmatmul.mubr.msk.bf16.vlgmr.msra.gmra.mrb[0].mxu0 %vm58_vm1, %v42_v3  ;;  %v335_v18 = vld [vmem:[%s610_s2] ss:$0 sm:$0xff]  ;;  %v442_v26 = vld [vmem:[%s613_s5 + $0x30] sm:$0xff]   ;;  %v443_v27 = vld [vmem:[%s613_s5 + $0x38] sm:$0xff]  }
  0x19   :  { %418 = vmatprep.mubr.msk.bf16.mxu0 %vm472_vm0, %v471_v0  ;;  %385 = vmatpush3.bf16.msra.mxu1 %v429_v5  ;;  %v338_v28 = vld [vmem:[%s612_s4] ss:$0 sm:$0xff] }
  0x1a   :  { %386 = vmatprep.subr.bf16.mxu1 %v471_v0  ;;  %403 = vmatpush3.bf16.msra.mxu0 %v436_v12  ;;  %v347_v36 = vld [vmem:[%s614_s6] ss:$0 sm:$0xff] }
  0x1b   :  { %404 = vmatprep.subr.bf16.mxu0 %v471_v0 }
  0x1d   :  { %387 = vmatpush3.bf16.msra.mxu1 %v430_v6 }
  0x1e   :  { %388 = vmatprep.subr.bf16.mxu1 %v471_v0  ;;  %405 = vmatpush3.bf16.msra.mxu0 %v437_v13 }
  0x1f   :  { %406 = vmatprep.subr.bf16.mxu0 %v471_v0 }
  0x21   :  { %389 = vmatpush3.bf16.msra.mxu1 %v431_v7 }
  0x22   :  { %390 = vmatprep.subr.bf16.mxu1 %v471_v0  ;;  %407 = vmatpush3.bf16.msra.mxu0 %v438_v14 }
  0x23   :  { %408 = vmatprep.subr.bf16.mxu0 %v471_v0 }
  0x25   :  { %391 = vmatpush3.bf16.msra.mxu1 %v432_v8 }
  0x26   :  { %392 = vmatprep.subr.bf16.mxu1 %v471_v0  ;;  %409 = vmatpush3.bf16.msra.mxu0 %v439_v15 }
  0x27   :  { %410 = vmatprep.subr.bf16.mxu0 %v471_v0 }
  0x29   :  { %393 = vmatpush3.bf16.msra.mxu1 %v433_v9 }
  0x2a   :  { %394 = vmatprep.subr.bf16.mxu1 %v471_v0  ;;  %411 = vmatpush3.bf16.msra.mxu0 %v440_v16 }
  0x2b   :  { %412 = vmatprep.subr.bf16.mxu0 %v471_v0 }
  0x2d   :  { %395 = vmatpush3.bf16.msra.mxu1 %v434_v10 }
  0x2e   :  { %396 = vmatprep.subr.bf16.mxu1 %v471_v0  ;;  %413 = vmatpush3.bf16.msra.mxu0 %v441_v17 }
  0x2f   :  { %414 = vmatprep.subr.bf16.mxu0 %v471_v0 }
  0x31   :  { %397 = vmatpush3.bf16.msra.mxu1 %v435_v11 }
  0x32   :  { %415 = vmatpush3.bf16.msra.mxu0 %v442_v26 }
  0x33   :  { %416 = vmatprep.subr.bf16.mxu0 %v471_v0 }
  0x36   :  { %417 = vmatpush3.bf16.msra.mxu0 %v443_v27 }
  0xeb   :  { %v96_v19 = vpop.f32.mrb[0].mxu0 }
  0xec   :  { %v97_v20 = vadd.f32 %v335_v18, %v96_v19  ;;  %v380_v21 = vpop.f32.mrb[1].mxu0 }
  0xed   :  { %v99_v22 = vpop.f32.mrb[2].mxu0 }
  0xee   :  { %v102_v23 = vmax.f32 %v97_v20, 0.0  ;;  %v381_v24 = vpop.f32.mrb[3].mxu0 }
  0xf0   :  { %v103_v25 = vpack.c.bf16 %v102_v23, %v102_v23 }
  0xf2   :  { %399 = vmatmul.mubr.bf16.vlgmr.msra.gmra.mrb[0].mxu1 %v103_v25 }
 0x1c5   :  { %v209_v29 = vpop.f32.mrb[0].mxu1 }
 0x1c6   :  { %v210_v30 = vadd.f32 %v338_v28, %v209_v29  ;;  %v400_v31 = vpop.f32.mrb[1].mxu1 }
 0x1c7   :  { %v212_v32 = vpop.f32.mrb[2].mxu1 }
 0x1c8   :  { %v215_v33 = vmax.f32 %v210_v30, 0.0  ;;  %v401_v34 = vpop.f32.mrb[3].mxu1 }
 0x1ca   :  { %v216_v35 = vpack.c.bf16 %v215_v33, %v215_v33 }
 0x1cc   :  { %419 = vmatmul.mubr.bf16.vlgmr.msra.gmra.mrb[4].mxu0 %v216_v35 }
 0x29f   :  { %v322_v37 = vpop.f32.mrb[4].mxu0 }
 0x2a0   :  { %v323_v38 = vadd.f32 %v347_v36, %v322_v37  ;;  %v420_v39 = vpop.f32.mrb[5].mxu0 }
 0x2a1   :  { %v325_v40 = vpop.f32.mrb[6].mxu0 }
 0x2a2   :  { %329 = vst.msk [vmem:[%s615_s7] sm:$0xff] %vm328_vm2, %v323_v38  ;;  %v421_v41 = vpop.f32.mrb[7].mxu0 }
 0x2a3   :  { %334 = vsyncpa [#allocation3], 1 }

</bundles_post_ra>
